<compile_context>
chip_gen: v7x
topology: tpu7x:2x2x1
jax: 0.10.0
libtpu: 0.0.40
codegen_flags: <defaults>
</compile_context>

<pallas_src>
from functools import partial

import jax
import jax.numpy as jnp
from jax.experimental import pallas as pl
from jax.experimental.pallas import tpu as pltpu

EPS = 1e-3          # BatchNorm2d(eps=0.001)
LEAKY_SLOPE = 0.01  # F.leaky_relu default negative_slope
LANE = 128

VMEM_TILE_BUDGET = 36 * 1024 * 1024   # cap on double-buffered tile footprint (v7x: 64 MiB VMEM)
VMEM_LIMIT_BYTES = 48 * 1024 * 1024   # explicit scoped limit: > 32 MiB default, < v7x physical


def _round_up(x, m):
    return (x + m - 1) // m * m


def _vmem_tile_bytes(rows, K, Cp, recompute):
    """Worst-case double-buffered VMEM footprint (bytes) across the two passes."""
    bf16, f32 = 2, 4
    w = 2 * K * Cp * bf16                       # resident weight slab, 2 buffers
    x = 2 * rows * K * bf16                     # im2col row tile, 2 buffers
    out = 2 * rows * Cp * f32                   # f32 output tile, 2 buffers
    vecs = 2 * 2 * Cp * f32                     # scale/shift or per-tile stats
    if recompute:
        return max(x + w + vecs, x + w + vecs + out)
    act = 2 * rows * Cp * bf16                  # bf16 activation tile, 2 buffers
    return max(x + w + act + vecs, act + vecs + out)


# --------------------------------------------------------------------------------------
# Kernel bodies
# --------------------------------------------------------------------------------------
def _conv_act(x, w, use_relu):
    """bf16 operands, f32 MXU accumulation, activation in f32."""
    acc = jnp.dot(x, w, preferred_element_type=jnp.float32)
    if use_relu:
        return jnp.maximum(acc, 0.0)
    return jnp.where(acc >= 0.0, acc, LEAKY_SLOPE * acc)


def _conv_stats_kernel(x_ref, w_ref, stats_ref, *, use_relu):
    """Pass 1 (recompute path): conv + act, emit only per-tile [sum, sum_sq]."""
    act = _conv_act(x_ref[...], w_ref[...], use_relu)
    stats_ref[0, 0:1, :] = jnp.sum(act, axis=0, keepdims=True)
    stats_ref[0, 1:2, :] = jnp.sum(act * act, axis=0, keepdims=True)


def _conv_act_stats_kernel(x_ref, w_ref, act_ref, stats_ref, *, use_relu):
    """Pass 1 (store_act path): stats from the f32 accumulator, then bf16 act store."""
    act = _conv_act(x_ref[...], w_ref[...], use_relu)
    stats_ref[0, 0:1, :] = jnp.sum(act, axis=0, keepdims=True)
    stats_ref[0, 1:2, :] = jnp.sum(act * act, axis=0, keepdims=True)
    act_ref[...] = act.astype(act_ref.dtype)


def _conv_bn_kernel(x_ref, w_ref, scale_ref, shift_ref, out_ref, *, use_relu):
    """Pass 2 (recompute path): recompute conv + act, apply y = act*scale + shift."""
    act = _conv_act(x_ref[...], w_ref[...], use_relu)
    out_ref[...] = act * scale_ref[...] + shift_ref[...]


def _bn_apply_kernel(act_ref, scale_ref, shift_ref, out_ref):
    """Pass 2 (store_act path): bf16 load, f32 FMA, f32 lane-dense store."""
    out_ref[...] = act_ref[...].astype(jnp.float32) * scale_ref[...] + shift_ref[...]


# --------------------------------------------------------------------------------------
# Wrapper: NCHW in / NCHW out, like the PyTorch module (stride 1).
# --------------------------------------------------------------------------------------
def basic_conv2d(x_nchw, weight_oihw, gamma, beta, *, padding=1, use_relu=True,
                 block_rows=512, compute_dtype=jnp.bfloat16, path="auto"):
    N, Cin, H, W = x_nchw.shape
    Cout, Cin_w, KH, KW = weight_oihw.shape
    assert Cin == Cin_w

    # NCHW -> NHWC; cast to bf16 BEFORE im2col so the materialized slab is half-size.
    x_nhwc = jnp.transpose(x_nchw, (0, 2, 3, 1)).astype(compute_dtype)
    x_pad = jnp.pad(x_nhwc, ((0, 0), (padding, padding), (padding, padding), (0, 0)))
    Hp, Wp = H + 2 * padding, W + 2 * padding
    Ho, Wo = Hp - KH + 1, Wp - KW + 1

    K = KH * KW * Cin                 # collapsed contraction dim (im2col)
    R = N * Ho * Wo                   # total output rows
    Cp = _round_up(Cout, LANE)        # lane-dense output channels

    # Path selection: drop the activation intermediate when re-reading x2d in pass 2 is
    # cheaper than round-tripping a (rows, Cp) activation slab (2*K vs 4*Cp bytes/row).
    if path == "auto":
        recompute = 2 * K <= 4 * Cp
    elif path == "recompute":
        recompute = True
    elif path == "store_act":
        recompute = False
    else:
        raise ValueError(f"unknown path {path!r}")

    # Row tiling: multiple of 8 sublanes; >= 2 tiles when there is enough work (v7x has
    # two TensorCores); shrink until the double-buffered footprint fits the VMEM budget.
    block_rows = _round_up(max(8, min(block_rows, R)), 8)
    if R >= 16 and pl.cdiv(R, block_rows) < 2:
        block_rows = _round_up(pl.cdiv(R, 2), 8)
    while block_rows > 8 and _vmem_tile_bytes(block_rows, K, Cp, recompute) > VMEM_TILE_BUDGET:
        block_rows = _round_up(block_rows // 2, 8)
    Rp = _round_up(R, block_rows)
    num_tiles = Rp // block_rows

    cparams = pltpu.CompilerParams(dimension_semantics=("parallel",),
                                   vmem_limit_bytes=VMEM_LIMIT_BYTES)

    # im2col in the wrapper (one XLA fusion), taps-major / channel-minor along K, in bf16.
    patches = [x_pad[:, kh:kh + Ho, kw:kw + Wo, :]
               for kh in range(KH) for kw in range(KW)]
    x2d = jnp.concatenate(patches, axis=-1).reshape(R, K)
    x2d = jnp.pad(x2d, ((0, Rp - R), (0, 0)))      # zero rows: contribute nothing to sums

    # Weight (Cout, Cin, KH, KW) -> (K, Cout), K-order matches x2d; pad Cout to 128 lanes.
    w2d = jnp.transpose(weight_oihw, (2, 3, 1, 0)).reshape(K, Cout)
    w2d = jnp.pad(w2d, ((0, 0), (0, Cp - Cout))).astype(compute_dtype)

    x_spec = pl.BlockSpec((block_rows, K), lambda i: (i, 0))
    w_spec = pl.BlockSpec((K, Cp), lambda i: (0, 0))
    rowcp_spec = pl.BlockSpec((block_rows, Cp), lambda i: (i, 0))
    stats_spec = pl.BlockSpec((1, 2, Cp), lambda i: (i, 0, 0))
    vec_spec = pl.BlockSpec((1, Cp), lambda i: (0, 0))
    stats_shape = jax.ShapeDtypeStruct((num_tiles, 2, Cp), jnp.float32)

    # ---- pass 1: conv + activation + per-tile partial BN statistics ----
    if recompute:
        stats = pl.pallas_call(
            partial(_conv_stats_kernel, use_relu=use_relu),
            out_shape=stats_shape,
            grid=(num_tiles,),
            in_specs=[x_spec, w_spec],
            out_specs=stats_spec,
            compiler_params=cparams,
        )(x2d, w2d)
        act = None
    else:
        act, stats = pl.pallas_call(
            partial(_conv_act_stats_kernel, use_relu=use_relu),
            out_shape=(jax.ShapeDtypeStruct((Rp, Cp), compute_dtype), stats_shape),
            grid=(num_tiles,),
            in_specs=[x_spec, w_spec],
            out_specs=(rowcp_spec, stats_spec),
            compiler_params=cparams,
        )(x2d, w2d)

    # ---- per-channel stats finalize (O(Cout) work; outside the hot kernels) ----
    sums = jnp.sum(stats, axis=0)                               # (2, Cp)
    count = jnp.float32(R)
    mean = sums[0] / count
    var = jnp.maximum(sums[1] / count - mean * mean, 0.0)       # biased batch variance
    gamma_p = jnp.pad(gamma.astype(jnp.float32), (0, Cp - Cout), constant_values=1.0)
    beta_p = jnp.pad(beta.astype(jnp.float32), (0, Cp - Cout))
    scale = (gamma_p * jax.lax.rsqrt(var + EPS)).reshape(1, Cp)
    shift = beta_p.reshape(1, Cp) - mean.reshape(1, Cp) * scale

    # ---- pass 2: y = act * scale + shift (lane-dense stores, pipelined, megacore) ----
    if recompute:
        y2d = pl.pallas_call(
            partial(_conv_bn_kernel, use_relu=use_relu),
            out_shape=jax.ShapeDtypeStruct((Rp, Cp), jnp.float32),
            grid=(num_tiles,),
            in_specs=[x_spec, w_spec, vec_spec, vec_spec],
            out_specs=rowcp_spec,
            compiler_params=cparams,
        )(x2d, w2d, scale, shift)
    else:
        y2d = pl.pallas_call(
            _bn_apply_kernel,
            out_shape=jax.ShapeDtypeStruct((Rp, Cp), jnp.float32),
            grid=(num_tiles,),
            in_specs=[rowcp_spec, vec_spec, vec_spec],
            out_specs=rowcp_spec,
            compiler_params=cparams,
        )(act, scale, shift)

    y = y2d[:R, :Cout].reshape(N, Ho, Wo, Cout)
    return jnp.transpose(y, (0, 3, 1, 2))                       # back to NCHW


# --------------------------------------------------------------------------------------
# Pure-JAX reference of the module forward (sanity check).
# --------------------------------------------------------------------------------------
def _reference(x, w, gamma, beta, *, padding, use_relu):
    conv = jax.lax.conv_general_dilated(
        x, w, window_strides=(1, 1), padding=[(padding, padding)] * 2,
        dimension_numbers=("NCHW", "OIHW", "NCHW"))
    if use_relu:
        act = jnp.maximum(conv, 0.0)
    else:
        act = jnp.where(conv >= 0.0, conv, LEAKY_SLOPE * conv)
    mean = jnp.mean(act, axis=(0, 2, 3), keepdims=True)
    var = jnp.mean((act - mean) ** 2, axis=(0, 2, 3), keepdims=True)
    return ((act - mean) * jax.lax.rsqrt(var + EPS) * gamma.reshape(1, -1, 1, 1)
            + beta.reshape(1, -1, 1, 1))


if __name__ == "__main__":
    # BasicConv2d(in_channels=4, out_channels=8, use_relu=True, kernel_size=3, padding=1)
    N, Cin, H, W = 2, 4, 16, 16
    Cout, KH, KW = 8, 3, 3

    key = jax.random.PRNGKey(0)
    kx, kw, kg, kb = jax.random.split(key, 4)

    x = jax.random.normal(kx, (N, Cin, H, W), dtype=jnp.float32)
    conv_weight = 0.1 * jax.random.normal(kw, (Cout, Cin, KH, KW), dtype=jnp.float32)
    bn_gamma = 1.0 + 0.1 * jax.random.normal(kg, (Cout,), dtype=jnp.float32)
    bn_beta = 0.1 * jax.random.normal(kb, (Cout,), dtype=jnp.float32)

    # Exercise both pass-2 strategies (auto picks "recompute" for this shape) plus the
    # leaky_relu branch; all checked against the pure-JAX reference.
    for use_relu, path in ((True, "auto"), (True, "store_act"), (False, "auto")):
        out = basic_conv2d(x, conv_weight, bn_gamma, bn_beta,
                           padding=1, use_relu=use_relu, path=path)
        jax.block_until_ready(out)
        assert out.shape == (N, Cout, H, W)
        ref = _reference(x, conv_weight, bn_gamma, bn_beta,
                         padding=1, use_relu=use_relu)
        max_err = float(jnp.max(jnp.abs(out - ref)))
        assert max_err < 5e-2, f"path={path} use_relu={use_relu}: max abs err {max_err}"

    print("KERNEL_OK")
</pallas_src>

<mosaic_0001>
module attributes {stable_mosaic.version = 11 : i64} {
  func.func @_conv_stats_kernel(%arg0: i32, %arg1: memref<256x36xbf16, #tpu.memory_space<vmem>>, %arg2: memref<36x128xbf16, #tpu.memory_space<vmem>>, %arg3: memref<1x2x128xf32, #tpu.memory_space<vmem>>) attributes {dimension_semantics = [#tpu.dimension_semantics<parallel>], iteration_bounds = array<i64: 2>, scalar_prefetch = 0 : i64, scratch_operands = 0 : i64, tpu.core_type = #tpu.core_type<tc>, window_params = [{transform_indices = @transform_0, window_bounds = array<i64: 256, 36>}, {pipeline_mode = #tpu.pipeline_mode<synchronous>, transform_indices = @transform_1, window_bounds = array<i64: 36, 128>}, {transform_indices = @transform_2, window_bounds = array<i64: 1, 2, 128>}]} {
    %c0 = arith.constant 0 : index
    %c0_0 = arith.constant 0 : index
    %0 = vector.load %arg1[%c0, %c0_0] : memref<256x36xbf16, #tpu.memory_space<vmem>>, vector<256x36xbf16>
    %c0_1 = arith.constant 0 : index
    %c0_2 = arith.constant 0 : index
    %1 = vector.load %arg2[%c0_1, %c0_2] : memref<36x128xbf16, #tpu.memory_space<vmem>>, vector<36x128xbf16>
    %cst = arith.constant dense<0.000000e+00> : vector<256x128xf32>
    %2 = tpu.matmul %0, %1, %cst {dimension_numbers = #tpu.dot_dimension_numbers<[1], [0], [0], [1], [0, 0, 1, 1], [], []>} : vector<256x36xbf16>, vector<36x128xbf16>, vector<256x128xf32> -> vector<256x128xf32>
    %cst_3 = arith.constant 0.000000e+00 : f32
    %3 = vector.broadcast %cst_3 : f32 to vector<256x128xf32>
    %4 = arith.maximumf %2, %3 : vector<256x128xf32>
    %cst_4 = arith.constant dense<0.000000e+00> : vector<128xf32>
    %5 = vector.multi_reduction <add>, %4, %cst_4 [0] : vector<256x128xf32> to vector<128xf32>
    %6 = vector.shape_cast %5 : vector<128xf32> to vector<1x128xf32>
    %c0_5 = arith.constant 0 : index
    %c0_6 = arith.constant 0 : index
    %c0_7 = arith.constant 0 : index
    %7 = vector.load %arg3[%c0_5, %c0_6, %c0_7] : memref<1x2x128xf32, #tpu.memory_space<vmem>>, vector<1x1x128xf32>
    %8 = vector.shape_cast %7 : vector<1x1x128xf32> to vector<1x128xf32>
    %9 = vector.shape_cast %6 : vector<1x128xf32> to vector<1x1x128xf32>
    tpu.vector_store %arg3[%c0_5, %c0_6, %c0_7], %9 {strides = array<i32>} : memref<1x2x128xf32, #tpu.memory_space<vmem>>, vector<1x1x128xf32>,
    %10 = arith.mulf %4, %4 : vector<256x128xf32>
    %cst_8 = arith.constant dense<0.000000e+00> : vector<128xf32>
    %11 = vector.multi_reduction <add>, %10, %cst_8 [0] : vector<256x128xf32> to vector<128xf32>
    %12 = vector.shape_cast %11 : vector<128xf32> to vector<1x128xf32>
    %c0_9 = arith.constant 0 : index
    %c1 = arith.constant 1 : index
    %c0_10 = arith.constant 0 : index
    %13 = vector.load %arg3[%c0_9, %c1, %c0_10] : memref<1x2x128xf32, #tpu.memory_space<vmem>>, vector<1x1x128xf32>
    %14 = vector.shape_cast %13 : vector<1x1x128xf32> to vector<1x128xf32>
    %15 = vector.shape_cast %12 : vector<1x128xf32> to vector<1x1x128xf32>
    tpu.vector_store %arg3[%c0_9, %c1, %c0_10], %15 {strides = array<i32>} : memref<1x2x128xf32, #tpu.memory_space<vmem>>, vector<1x1x128xf32>,
    return
  }
  func.func @transform_0(%arg0: i32) -> (i32, i32) {
    %c0_i32 = arith.constant 0 : i32
    %c0_i32_0 = arith.constant 0 : i32
    return %arg0, %c0_i32 : i32, i32
  }
  func.func @transform_1(%arg0: i32) -> (i32, i32) {
    %c0_i32 = arith.constant 0 : i32
    %c0_i32_0 = arith.constant 0 : i32
    %c0_i32_1 = arith.constant 0 : i32
    return %c0_i32, %c0_i32_0 : i32, i32
  }
  func.func @transform_2(%arg0: i32) -> (i32, i32, i32) {
    %c0_i32 = arith.constant 0 : i32
    %c0_i32_0 = arith.constant 0 : i32
    %c0_i32_1 = arith.constant 0 : i32
    return %arg0, %c0_i32, %c0_i32_0 : i32, i32, i32
  }
}

</mosaic_0001>

<bundles_post_ra>
// kernel: tpu_custom_call.1
= control target key start
LH: loop header
LB: loop body
LE: loop exit
PB: predicated region body
PF: predicated region fallthrough
CT: control target
= control target key end

     0   :  { %7 = vsyncpa [#allocation3], 0  ;;  %s1128_s0 = inlined_call_operand.vmem [shape: bf16[512,36], index: 0, kind: input, shape index: {}]   ;;  %s1129_s1 = inlined_call_operand.vmem [shape: bf16[36,128], index: 1, kind: input, shape index: {}]   ;;  %s1130_s2 = inlined_call_operand.hbm [shape: f32[2,2,128], index: 2, kind: output, shape index: {}]  }
   0x1   :  { %9 = vsyncpa [#allocation3 + $0x1], 0  ;;  %s953_s9 = smov 0   ;;  %s955_s10 = smov 0  }
   0x2   :  { %s957_s11 = smov 0   ;;  %s959_s12 = smov 0  }
   0x3 LB: > { %s703_s13 = sadd.s32 4294967295, %s935_s12   ;;  %s704_s14 = sadd.s32 4294967294, %s935_s12   ;;  %s935_s12 = sphi %s959_s12, %s1136_s12   ;;  %s931_s11 = sphi %s957_s11, %s1135_s11   ;;  %s927_s10 = sphi %s955_s10, %s1134_s10   ;;  %s923_s9 = sphi %s953_s9, %s1133_s9  }
   0x4   : > { %s976_s15 = sadd.s32 1, %s935_s12   ;;  %s69_s16 = sadd.s32 1, %s931_s11 }
   0x5   : > { %s66_s17 = ssub.s32 %s935_s12, %s976_s15  ;;  %p79_p0 = scmp.ne.s32.totalorder %s931_s11, %s927_s10 }
   0x6   : > { %p67_p1 = scmp.eq.s32.totalorder %s66_s17, 0  ;;  %p80_p2 = scmp.eq.s32.totalorder %s703_s13, 1 }
   0x7   : > { %p85_p3 = scmp.ne.s32.totalorder %s927_s10, %s923_s9  ;;  %p86_p4 = scmp.eq.s32.totalorder %s704_s14, 1 }
   0x8   : > { %s986_s18 = scalar_select %p67_p1, %s931_s11, %s69_s16  }
   0x9   : > { %p988_p5 = por %p80_p2, %p79_p0  ;;  %p992_p6 = por %p86_p4, %p85_p3 }
   0xa   : > { %p707_p7 = scmp.ge.s32.totalorder %s935_s12, 1  ;;  %p116_p8 = scmp.lt.s32.totalorder %s935_s12, 3 }
   0xc   : > { %p117_p9 = pnand %p707_p7, %p116_p8 }
   0xd   : > { %v854_v0 = vld [vmem:[%s1129_s1] sm:$0xff] (!%p117_p9)   ;;  %v855_v1 = vld [vmem:[%s1129_s1 + $0x8] sm:$0xff] (!%p117_p9)   ;;  %s1004_s25 = sshll.u32 (!%p117_p9), %s703_s13, 5  ;;  %v856_v2 = vld [vmem:[%s1129_s1 + $0x10] ss:$0 sps:$4 sm:$0x33] (!%p117_p9)  }
   0xe   : > { %120 = sbr.rel (%p117_p9) target bundleno = 334 (0x14e), region = 28  ;;  %769 = vmatprep.subr.bf16.mxu0 (!%p117_p9), %v854_v0  ;;  %p139_p10 = scmp.lt.s32.totalorder (!%p117_p9), %s1004_s25, 63  ;;  %807 = vmatprep.subr.bf16.mxu1 (!%p117_p9), %v854_v0  ;;  %vm326_vm0 = vcmask (!%p117_p9), 1041408   ;;  %vm277_vm1 = vcmask (!%p117_p9), 293888  }
   0xf   : > { %770 = vmatpush3.bf16.msra.mxu0 (!%p117_p9), %v854_v0  ;;  %810 = vmatpush3.bf16.msra.mxu1 (!%p117_p9), %v854_v0  ;;  %v328_v3 = vsel (!%p117_p9), %vm326_vm0, %v856_v2, 0  ;;  %s135_s5 = sand.u32 (!%p117_p9), 1, %s927_s10   ;;  %s1086_s16 = scalar_lea.hbm (!%p117_p9), %s1130_s2, %s1004_s25 }
  0x10   : > { %771 = vmatprep.subr.bf16.mxu0 (!%p117_p9), %v855_v1  ;;  %808 = vmatprep.subr.bf16.mxu1 (!%p117_p9), %v855_v1  ;;  %s708_s6 = sshll.u32 (!%p117_p9), %s135_s5, 1  ;;  %s632_s17 = scalar_lea.sflag (!%p117_p9), [#allocation3], %s135_s5 }
  0x11   : > { %s137_s7 = scalar_lea.vmem (!%p117_p9), [#allocation2], %s708_s6  ;;  %s937_s22 = smov (!%p117_p9), [#allocation2]  }
  0x12   : > { %s645_s8 = sshll.u32 (!%p117_p9), %s137_s7, 4  ;;  %s877_s23 = sshll.u32 (!%p117_p9), %s937_s22, 4  ;;  %s1088_s8 = int_to_ptr.vmem [resolvable:$true] %s645_s8  ;;  %s878_s23 = int_to_ptr.vmem [resolvable:$false] %s877_s23 }
  0x13   : > { %772 = vmatpush3.bf16.msra.mxu0 (!%p117_p9), %v855_v1  ;;  %811 = vmatpush3.bf16.msra.mxu1 (!%p117_p9), %v855_v1  ;;  %s873_s21 = scalar_lea.vmem (!%p117_p9), %s1088_s8, 32  ;;  %s879_s24 = scalar_lea.vmem (!%p117_p9), %s878_s23, 64 }
  0x14   : > { %813 = vmatprep.subr.msk.bf16.mxu0 (!%p117_p9), %vm326_vm0, %v856_v2  ;;  %814 = vmatprep.subr.msk.bf16.mxu1 (!%p117_p9), %vm326_vm0, %v856_v2  ;;  %p874_p11 = scmp.ne.s32.totalorder (!%p117_p9), %s1088_s8, %s873_s21  ;;  %p880_p0 = scmp.lt.s32.totalorder (!%p117_p9), %s1088_s8, %s878_s23 }
  0x15   : > { %s140_s28 = scalar_select %p139_p10, %s1004_s25, 63 }
  0x16   : > { %p875_p12 = pnand %p874_p11, %p988_p5  ;;  %p881_p1 = scmp.lt.s32.totalorder %s879_s24, %s873_s21 }
  0x17   : > { %s710_s29 = sshll.u32 %s140_s28, 2  ;;  %774 = vmatpush3.bf16.msra.mxu0 %v328_v3  ;;  %812 = vmatpush3.bf16.msra.mxu1 %v328_v3 }
  0x18   : > { %s1014_s4 = scalar_lea.vmem %s1128_s0, %s710_s29  ;;  %p876_p13 = pneg %p875_p12 }
  0x19   : > { %v857_v4 = vld [vmem:[%s1014_s4] sm:$0xff]   ;;  %v858_v5 = vld [vmem:[%s1014_s4 + $0x8] sm:$0xff]   ;;  %v859_v6 = vld [vmem:[%s1014_s4 + $0x10] sm:$0xff]   ;;  %p882_p2 = por %p881_p1, %p880_p0 }
  0x1a   : > { %775 = vmatprep.mubr.msk.bf16.mxu0 %vm277_vm1, %v857_v4  ;;  %v860_v7 = vld [vmem:[%s1014_s4 + $0x18] sm:$0xff]   ;;  %v865_v8 = vld [vmem:[%s1014_s4 + $0x40] sm:$0xff]   ;;  %v866_v9 = vld [vmem:[%s1014_s4 + $0x48] sm:$0xff]  }
  0x1b   : > { %776 = vmatmul.mubr.msk.bf16.vlgmr.msra.gmra.mrb[0].mxu0 %vm277_vm1, %v858_v5  ;;  %791 = vmatprep.mubr.msk.bf16.mxu1 %vm277_vm1, %v865_v8  ;;  %v867_v10 = vld [vmem:[%s1014_s4 + $0x50] sm:$0xff]   ;;  %v861_v11 = vld [vmem:[%s1014_s4 + $0x20] sm:$0xff]   ;;  %v868_v12 = vld [vmem:[%s1014_s4 + $0x58] sm:$0xff]   ;;  %p883_p3 = pnand %p882_p2, %p876_p13 }
  0x1c   : > { %779 = vmatprep.mubr.msk.bf16.mxu0 %vm277_vm1, %v859_v6  ;;  %792 = vmatmul.mubr.msk.bf16.vlgmr.msra.gmra.mrb[0].mxu1 %vm277_vm1, %v866_v9  ;;  %v869_v13 = vld [vmem:[%s1014_s4 + $0x60] sm:$0xff]   ;;  %v862_v14 = vld [vmem:[%s1014_s4 + $0x28] sm:$0xff]   ;;  %v863_v15 = vld [vmem:[%s1014_s4 + $0x30] sm:$0xff]  }
  0x1d   : > { %795 = vmatprep.mubr.msk.bf16.mxu1 %vm277_vm1, %v867_v10  ;;  %v870_v16 = vld [vmem:[%s1014_s4 + $0x68] sm:$0xff]   ;;  %v871_v17 = vld [vmem:[%s1014_s4 + $0x70] sm:$0xff]   ;;  %v864_v18 = vld [vmem:[%s1014_s4 + $0x38] sm:$0xff]  }
  0x1e   : > { %v872_v19 = vld [vmem:[%s1014_s4 + $0x78] sm:$0xff]  }
  0x23   : > { %780 = vmatmul.mubr.msk.bf16.gmra.mrb[4].mxu0 %vm277_vm1, %v860_v7 }
  0x24   : > { %783 = vmatprep.mubr.msk.bf16.mxu0 %vm277_vm1, %v861_v11  ;;  %796 = vmatmul.mubr.msk.bf16.gmra.mrb[4].mxu1 %vm277_vm1, %v868_v12 }
  0x25   : > { %799 = vmatprep.mubr.msk.bf16.mxu1 %vm277_vm1, %v869_v13 }
  0x2b   : > { %784 = vmatmul.mubr.msk.bf16.gmra.mrb[8].mxu0 %vm277_vm1, %v862_v14 }
  0x2c   : > { %787 = vmatprep.mubr.msk.bf16.mxu0 %vm277_vm1, %v863_v15  ;;  %800 = vmatmul.mubr.msk.bf16.gmra.mrb[8].mxu1 %vm277_vm1, %v870_v16 }
  0x2d   : > { %803 = vmatprep.mubr.msk.bf16.mxu1 %vm277_vm1, %v871_v17 }
  0x33   : > { %788 = vmatmul.mubr.msk.bf16.gmra.mrb[12].mxu0 %vm277_vm1, %v864_v18 }
  0x34   : > { %804 = vmatmul.mubr.msk.bf16.gmra.mrb[12].mxu1 %vm277_vm1, %v872_v19 }
  0xee   : > { %v777_v20 = vpop.f32.mrb[0].mxu0 }
  0xef   : > { %v364_v21 = vpop.f32.mrb[1].mxu0  ;;  %v493_v25 = vmax.f32 %v777_v20, 0.0  ;;  %v1048_v27 = vpop.f32.mrb[0].mxu1 }
  0xf0   : > { %v491_v22 = vmax.f32 %v364_v21, 0.0  ;;  %v778_v23 = vpop.f32.mrb[2].mxu0  ;;  %v1050_v32 = vpop.f32.mrb[1].mxu1 }
  0xf1   : > { %v367_v24 = vpop.f32.mrb[3].mxu0  ;;  %v494_v29 = vmax.f32 %v778_v23, 0.0  ;;  %v1052_v33 = vpop.f32.mrb[2].mxu1  ;;  %v563_v34 = vmul.f32 %v493_v25, %v493_v25 }
  0xf2   : > { %v492_v26 = vmax.f32 %v367_v24, 0.0  ;;  %v561_v28 = vmul.f32 %v491_v22, %v491_v22  ;;  %v1054_v38 = vpop.f32.mrb[3].mxu1 }
  0xf3   : > { %v564_v40 = vmul.f32 %v494_v29, %v494_v29 }
  0xf4   : > { %v523_v30 = vadd.f32 %v492_v26, %v491_v22  ;;  %v562_v31 = vmul.f32 %v492_v26, %v492_v26 }
  0xf6   : > { %v524_v35 = vadd.f32 %v523_v30, %v493_v25  ;;  %v593_v36 = vadd.f32 %v562_v31, %v561_v28  ;;  %v781_v37 = vpop.f32.mrb[4].mxu0 }
  0xf7   : > { %v380_v39 = vpop.f32.mrb[5].mxu0  ;;  %v497_v45 = vmax.f32 %v781_v37, 0.0  ;;  %v1056_v51 = vpop.f32.mrb[4].mxu1 }
  0xf8   : > { %v594_v41 = vadd.f32 %v593_v36, %v563_v34  ;;  %v495_v42 = vmax.f32 %v380_v39, 0.0  ;;  %v525_v43 = vadd.f32 %v524_v35, %v494_v29  ;;  %v782_v44 = vpop.f32.mrb[6].mxu0  ;;  %v1058_v56 = vpop.f32.mrb[5].mxu1  ;;  %v507_v39 = vmax.f32 %v1050_v32, 0.0 }
  0xf9   : > { %v383_v46 = vpop.f32.mrb[7].mxu0  ;;  %v498_v53 = vmax.f32 %v782_v44, 0.0  ;;  %v1060_v57 = vpop.f32.mrb[6].mxu1  ;;  %v567_v58 = vmul.f32 %v497_v45, %v497_v45  ;;  %v509_v32 = vmax.f32 %v1048_v27, 0.0  ;;  %v513_v27 = vmax.f32 %v1056_v51, 0.0 }
  0xfa   : > { %v526_v47 = vadd.f32 %v525_v43, %v495_v42  ;;  %v565_v48 = vmul.f32 %v495_v42, %v495_v42  ;;  %v595_v49 = vadd.f32 %v594_v41, %v564_v40  ;;  %v496_v50 = vmax.f32 %v383_v46, 0.0  ;;  %v1062_v62 = vpop.f32.mrb[7].mxu1 }
  0xfb   : > { %v568_v0 = vmul.f32 %v498_v53, %v498_v53 }
  0xfc   : > { %v596_v52 = vadd.f32 %v595_v49, %v565_v48  ;;  %v527_v54 = vadd.f32 %v526_v47, %v496_v50  ;;  %v566_v55 = vmul.f32 %v496_v50, %v496_v50 }
  0xfe   : > { %v528_v59 = vadd.f32 %v527_v54, %v497_v45  ;;  %v597_v60 = vadd.f32 %v596_v52, %v566_v55  ;;  %v785_v61 = vpop.f32.mrb[8].mxu0  ;;  %v577_v52 = vmul.f32 %v507_v39, %v507_v39 }
  0xff   : > { %v396_v63 = vpop.f32.mrb[9].mxu0  ;;  %v501_v5 = vmax.f32 %v785_v61, 0.0  ;;  %v1064_v11 = vpop.f32.mrb[8].mxu1  ;;  %v510_v61 = vmax.f32 %v1052_v33, 0.0  ;;  %v514_v33 = vmax.f32 %v1060_v57, 0.0 }
 0x100   : > { %v598_v1 = vadd.f32 %v597_v60, %v567_v58  ;;  %v499_v2 = vmax.f32 %v396_v63, 0.0  ;;  %v529_v3 = vadd.f32 %v528_v59, %v498_v53  ;;  %v786_v4 = vpop.f32.mrb[10].mxu0  ;;  %v460_v16 = vpop.f32.mrb[9].mxu1  ;;  %v508_v58 = vmax.f32 %v1054_v38, 0.0 }
 0x101   : > { %v399_v6 = vpop.f32.mrb[11].mxu0  ;;  %v502_v13 = vmax.f32 %v786_v4, 0.0  ;;  %v1066_v17 = vpop.f32.mrb[10].mxu1  ;;  %v571_v18 = vmul.f32 %v501_v5, %v501_v5  ;;  %v512_v38 = vmax.f32 %v1062_v62, 0.0  ;;  %v517_v62 = vmax.f32 %v1064_v11, 0.0 }
 0x102   : > { %v530_v7 = vadd.f32 %v529_v3, %v499_v2  ;;  %v569_v8 = vmul.f32 %v499_v2, %v499_v2  ;;  %v599_v9 = vadd.f32 %v598_v1, %v568_v0  ;;  %v500_v10 = vmax.f32 %v399_v6, 0.0  ;;  %v463_v22 = vpop.f32.mrb[11].mxu1 }
 0x103   : > { %v572_v24 = vmul.f32 %v502_v13, %v502_v13  ;;  %v578_v1 = vmul.f32 %v508_v58, %v508_v58  ;;  %v511_v2 = vmax.f32 %v1058_v56, 0.0  ;;  %v579_v3 = vmul.f32 %v509_v32, %v509_v32 }
 0x104   : > { %v600_v12 = vadd.f32 %v599_v9, %v569_v8  ;;  %v531_v14 = vadd.f32 %v530_v7, %v500_v10  ;;  %v570_v15 = vmul.f32 %v500_v10, %v500_v10  ;;  %v580_v6 = vmul.f32 %v510_v61, %v510_v61 }
 0x105   : > { %v581_v9 = vmul.f32 %v511_v2, %v511_v2  ;;  %v583_v56 = vmul.f32 %v513_v27, %v513_v27 }
 0x106   : > { %v532_v19 = vadd.f32 %v531_v14, %v501_v5  ;;  %v601_v20 = vadd.f32 %v600_v12, %v570_v15  ;;  %v789_v21 = vpop.f32.mrb[12].mxu0  ;;  %v582_v15 = vmul.f32 %v512_v38, %v512_v38 }
 0x107   : > { %v412_v23 = vpop.f32.mrb[13].mxu0  ;;  %v505_v30 = vmax.f32 %v789_v21, 0.0  ;;  %v1069_v40 = vpop.f32.mrb[12].mxu1  ;;  %v584_v21 = vmul.f32 %v514_v33, %v514_v33 }
 0x108   : > { %v602_v25 = vadd.f32 %v601_v20, %v571_v18  ;;  %v503_v26 = vmax.f32 %v412_v23, 0.0  ;;  %v533_v28 = vadd.f32 %v532_v19, %v502_v13  ;;  %v790_v29 = vpop.f32.mrb[14].mxu0  ;;  %v476_v45 = vpop.f32.mrb[13].mxu1  ;;  %v515_v18 = vmax.f32 %v460_v16, 0.0 }
 0x109   : > { %v415_v31 = vpop.f32.mrb[15].mxu0  ;;  %v506_v42 = vmax.f32 %v790_v29, 0.0  ;;  %v806_v46 = vpop.f32.mrb[14].mxu1  ;;  %v575_v47 = vmul.f32 %v505_v30, %v505_v30  ;;  %v518_v29 = vmax.f32 %v1066_v17, 0.0 }
 0x10a   : > { %v534_v34 = vadd.f32 %v533_v28, %v503_v26  ;;  %v573_v35 = vmul.f32 %v503_v26, %v503_v26  ;;  %v603_v36 = vadd.f32 %v602_v25, %v572_v24  ;;  %v504_v37 = vmax.f32 %v415_v31, 0.0  ;;  %v479_v50 = vpop.f32.mrb[15].mxu1 }
 0x10b   : > { %v576_v53 = vmul.f32 %v506_v42, %v506_v42  ;;  %v585_v25 = vmul.f32 %v515_v18, %v515_v18  ;;  %v516_v26 = vmax.f32 %v463_v22, 0.0  ;;  %v521_v22 = vmax.f32 %v1069_v40, 0.0 }
 0x10c   : > { %v604_v41 = vadd.f32 %v603_v36, %v573_v35  ;;  %v535_v43 = vadd.f32 %v534_v34, %v504_v37  ;;  %v574_v44 = vmul.f32 %v504_v37, %v504_v37  ;;  %v519_v34 = vmax.f32 %v476_v45, 0.0 }
 0x10d   : > { %v586_v31 = vmul.f32 %v516_v26, %v516_v26  ;;  %v587_v35 = vmul.f32 %v517_v62, %v517_v62  ;;  %v588_v37 = vmul.f32 %v518_v29, %v518_v29 }
 0x10e   : > { %v536_v48 = vadd.f32 %v535_v43, %v505_v30  ;;  %v605_v49 = vadd.f32 %v604_v41, %v574_v44  ;;  %v520_v43 = vmax.f32 %v479_v50, 0.0 }
 0x110   : > { %v606_v54 = vadd.f32 %v605_v49, %v575_v47  ;;  %v537_v55 = vadd.f32 %v536_v48, %v506_v42  ;;  %v589_v42 = vmul.f32 %v519_v34, %v519_v34  ;;  %v522_v48 = vmax.f32 %v806_v46, 0.0 }
 0x111   : > { %v590_v49 = vmul.f32 %v520_v43, %v520_v43 }
 0x112   : > { %v538_v59 = vadd.f32 %v537_v55, %v507_v39  ;;  %v607_v60 = vadd.f32 %v606_v54, %v576_v53  ;;  %v592_v54 = vmul.f32 %v522_v48, %v522_v48 }
 0x114   : > { %v608_v63 = vadd.f32 %v607_v60, %v577_v52  ;;  %v539_v0 = vadd.f32 %v538_v59, %v508_v58  ;;  %v591_v52 = vmul.f32 %v521_v22, %v521_v22 }
 0x116   : > { %v540_v4 = vadd.f32 %v539_v0, %v509_v32  ;;  %v609_v5 = vadd.f32 %v608_v63, %v578_v1 }
 0x118   : > { %v610_v7 = vadd.f32 %v609_v5, %v579_v3  ;;  %v541_v8 = vadd.f32 %v540_v4, %v510_v61 }
 0x11a   : > { %v542_v10 = vadd.f32 %v541_v8, %v511_v2  ;;  %v611_v12 = vadd.f32 %v610_v7, %v580_v6 }
 0x11c   : > { %v612_v13 = vadd.f32 %v611_v12, %v581_v9  ;;  %v543_v14 = vadd.f32 %v542_v10, %v512_v38 }
 0x11e   : > { %v544_v19 = vadd.f32 %v543_v14, %v513_v27  ;;  %v613_v20 = vadd.f32 %v612_v13, %v582_v15 }
 0x120   : > { %v614_v23 = vadd.f32 %v613_v20, %v583_v56  ;;  %v545_v24 = vadd.f32 %v544_v19, %v514_v33 }
 0x122   : > { %v546_v28 = vadd.f32 %v545_v24, %v515_v18  ;;  %v615_v51 = vadd.f32 %v614_v23, %v584_v21 }
 0x124   : > { %v616_v30 = vadd.f32 %v615_v51, %v585_v25  ;;  %v547_v57 = vadd.f32 %v546_v28, %v516_v26 }
 0x126   : > { %v548_v16 = vadd.f32 %v547_v57, %v517_v62  ;;  %v617_v36 = vadd.f32 %v616_v30, %v586_v31 }
 0x128   : > { %v618_v39 = vadd.f32 %v617_v36, %v587_v35  ;;  %v549_v41 = vadd.f32 %v548_v16, %v518_v29 }
 0x12a   : > { %v550_v11 = vadd.f32 %v549_v41, %v519_v34  ;;  %v619_v44 = vadd.f32 %v618_v39, %v588_v37 }
 0x12c   : > { %v620_v47 = vadd.f32 %v619_v44, %v589_v42  ;;  %v551_v17 = vadd.f32 %v550_v11, %v520_v43 }
 0x12e   : > { %v552_v53 = vadd.f32 %v551_v17, %v521_v22  ;;  %v621_v45 = vadd.f32 %v620_v47, %v590_v49 }
 0x130   : > { %v553_v55 = vadd.f32 %v552_v53, %v522_v48  ;;  %v622_v58 = vadd.f32 %v621_v45, %v591_v52 }
 0x132   : > { %v554_v32 = vrot.slane %v553_v55, 4  ;;  %v623_v59 = vadd.f32 %v622_v58, %v592_v54 }
 0x134   : > { %v555_v50 = vadd.f32 %v554_v32, %v553_v55  ;;  %v624_v60 = vrot.slane %v623_v59, 4 }
 0x136   : > { %v556_v40 = vrot.slane %v555_v50, 2  ;;  %v625_v61 = vadd.f32 %v624_v60, %v623_v59 }
 0x138   : > { %v557_v63 = vadd.f32 %v556_v40, %v555_v50  ;;  %v626_v46 = vrot.slane %v625_v61, 2 }
 0x13a   : > { %v558_v0 = vrot.slane %v557_v63, 1  ;;  %v627_v1 = vadd.f32 %v626_v46, %v625_v61 }
 0x13c   : > { %v559_v2 = vadd.f32 %v558_v0, %v557_v63  ;;  %v628_v3 = vrot.slane %v627_v1, 1 }
 0x13e   : > { %560 = vst [vmem:[%s137_s7] sm:$0x1] %v559_v2  ;;  %v629_v4 = vadd.f32 %v628_v3, %v627_v1 }
 0x140   : > { %630 = vst [vmem:[%s137_s7 + $0x1] sm:$0x1] %v629_v4 }
 0x141   : > { %886 = shalt.err (!%p883_p3)
}
 0x142   : > { %s887_s25 = scalar_lea.hbm %s1086_s16, 32  ;;  %s891_s28 = scalar_lea.hbm %s1130_s2, 64 }
 0x143   : > { %p888_p4 = scmp.ne.s32.totalorder %s1086_s16, %s887_s25  ;;  %p892_p9 = scmp.lt.u32.totalorder %s1086_s16, %s1130_s2 }
 0x144   : > { %p893_p10 = scmp.lt.u32.totalorder %s891_s28, %s887_s25  ;;  %p895_p12 = scmp.lt.u32.totalorder %s887_s25, %s1086_s16 }
 0x145   : > { %p889_p7 = pnand %p888_p4, %p988_p5 }
 0x146   : > { %p894_p11 = por %p893_p10, %p892_p9 }
 0x147   : > { %p890_p8 = pneg %p889_p7 }
 0x148   : > { %p896_p13 = por %p895_p12, %p894_p11 }
 0x14a   : > { %p897_p0 = pnand %p896_p13, %p890_p8 }
 0x14c   : > { %900 = shalt.err (!%p897_p0)
}
 0x14d   : > { %815 = dma.vmem_to_hbm [thread:$0]  (%p988_p5), %s1088_s8, 32, %s1086_s16, %s632_s17  }
 0x14e PF: > { %p821_p1 = scmp.ge.s32.totalorder %s935_s12, 2  ;;  %s657_s3 = sand.u32 1, %s923_s9  }
 0x14f   : > { %s658_s4 = scalar_lea.sflag [#allocation3], %s657_s3 }
 0x150   : > { %p818_p2 = pnand %p821_p1, %p992_p6 }
 0x152   : > { %918 = dma.done.wait (!%p818_p2), %s658_s4, 32  }
 0x153   : > { %920 = vsyncadd (!%p818_p2), %s658_s4, 4294967264  ;;  %p12_p3 = scmp.ge.s32.totalorder %s976_s15, 4   ;;  %s1133_s9 = smov %s927_s10 }
 0x154   : > { %s1134_s10 = smov %s931_s11  ;;  %s1135_s11 = smov %s986_s18 }
 0x155   : > { %s1136_s12 = smov %s976_s15  ;;  %14 = sbr.rel (!%p12_p3) target bundleno = 3 (0x3), region = 63 }
 0x15c   :  { %663 = vsyncpa [#allocation3], 1 }
 0x15d   :  { %665 = vsyncpa [#allocation3 + $0x1], 1 }

</bundles_post_ra>
